<compile_context>
chip_gen: v6e
topology: v6e:2x2x1
jax: 0.10.0
libtpu: 0.0.40
codegen_flags: <defaults>
</compile_context>

<pallas_src>
import functools

import jax
import jax.numpy as jnp
from jax.experimental import pallas as pl
from jax.experimental.pallas import tpu as pltpu

LN_EPS = 1e-12


def _default_vmem_limit():
    # ~75% of physical per-core VMEM: v5e/v6e 128 MiB -> 96 MiB, v7x 64 -> 48.
    try:
        cap = int(pltpu.get_tpu_info().vmem_capacity_bytes)
    except Exception:
        cap = 64 * 1024 * 1024
    return (cap * 3) // 4


VMEM_LIMIT_BYTES = _default_vmem_limit()


def _round_up(x, m):
    return ((x + m - 1) // m) * m


def _pick_tile(dim, target):
    """Largest tile == target if it evenly divides dim, else full dim."""
    if dim >= target and dim % target == 0:
        return target
    return dim


def _choose_tm(M, target):
    """Row-tile size: target when M is large, else M rounded up to sublanes."""
    if M >= target:
        return target
    return max(8, _round_up(M, 8))


def _pad_rows(x, multiple):
    M = x.shape[0]
    Mp = _round_up(M, multiple)
    if Mp == M:
        return x
    return jnp.pad(x, ((0, Mp - M), (0, 0)))


def _choose_tk(K, explicit=None):
    if explicit is not None:
        return _pick_tile(K, explicit)
    return K if K <= 1536 else _pick_tile(K, 1536)


# ----------------------------- Pallas kernels -----------------------------

def _dense_epilogue(acc, bias, activation, out_dtype):
    y = acc + bias
    if activation == "gelu":
        # TODO(synk): HF BERT default is exact erf GELU; tanh approx used here
        # for a guaranteed Mosaic lowering (diff ~1e-3 in logits).
        y = jax.nn.gelu(y, approximate=True)
    elif activation == "tanh":
        y = jnp.tanh(y)
    return y.astype(out_dtype)


def _dense_kernel_onek(x_ref, w_ref, b_ref, o_ref, *, activation):
    # Single reduction step: no accumulator scratch, no init/finalize phases.
    acc = jnp.dot(x_ref[...], w_ref[...], preferred_element_type=jnp.float32)
    o_ref[...] = _dense_epilogue(acc, b_ref[...], activation, o_ref.dtype)


def _dense_kernel_multik(x_ref, w_ref, b_ref, o_ref, acc_ref, *, activation):
    # grid = (M//tm, N//tn, K//tk); K is the innermost (reduction) axis.
    @pl.when(pl.program_id(2) == 0)
    def _():
        acc_ref[...] = jnp.zeros_like(acc_ref)

    acc_ref[...] += jnp.dot(x_ref[...], w_ref[...],
                            preferred_element_type=jnp.float32)

    @pl.when(pl.program_id(2) == pl.num_programs(2) - 1)
    def _():
        o_ref[...] = _dense_epilogue(acc_ref[...], b_ref[...], activation,
                                     o_ref.dtype)


def _res_ln_epilogue(y, gamma, beta, eps, out_dtype):
    mean = jnp.mean(y, axis=-1, keepdims=True)
    var = jnp.mean((y - mean) ** 2, axis=-1, keepdims=True)
    return ((y - mean) * jax.lax.rsqrt(var + eps) * gamma + beta
            ).astype(out_dtype)


def _dense_res_ln_kernel_onek(x_ref, w_ref, b_ref, res_ref, g_ref, beta_ref,
                              o_ref, *, eps):
    y = (jnp.dot(x_ref[...], w_ref[...], preferred_element_type=jnp.float32)
         + b_ref[...] + res_ref[...].astype(jnp.float32))
    o_ref[...] = _res_ln_epilogue(y, g_ref[...], beta_ref[...], eps,
                                  o_ref.dtype)


def _dense_res_ln_kernel_multik(x_ref, w_ref, b_ref, res_ref, g_ref, beta_ref,
                                o_ref, acc_ref, *, eps):
    # grid = (M//tm, K//tk); full hidden dim N lives in one output tile so the
    # LayerNorm reduction can run in the matmul epilogue.
    @pl.when(pl.program_id(1) == 0)
    def _():
        acc_ref[...] = jnp.zeros_like(acc_ref)

    acc_ref[...] += jnp.dot(x_ref[...], w_ref[...],
                            preferred_element_type=jnp.float32)

    @pl.when(pl.program_id(1) == pl.num_programs(1) - 1)
    def _():
        y = acc_ref[...] + b_ref[...] + res_ref[...].astype(jnp.float32)
        o_ref[...] = _res_ln_epilogue(y, g_ref[...], beta_ref[...], eps,
                                      o_ref.dtype)


def _layernorm_kernel(x_ref, g_ref, b_ref, o_ref, *, eps):
    x = x_ref[...].astype(jnp.float32)
    mean = jnp.mean(x, axis=-1, keepdims=True)
    var = jnp.mean((x - mean) ** 2, axis=-1, keepdims=True)
    o_ref[...] = ((x - mean) * jax.lax.rsqrt(var + eps)
                  * g_ref[...] + b_ref[...]).astype(o_ref.dtype)


def _attention_kernel(q_ref, k_ref, v_ref, mask_ref, o_ref, *,
                      num_heads, scale):
    # One batch element per grid step. q/k/v refs are H-wide column strips of
    # the fused QKV tensor: shape (S, H). Head split is done with static lane
    # slices; the output block is the lane-dense (S, H) context.
    S, H = q_ref.shape
    hd = H // num_heads
    mbias = mask_ref[0]                          # (1, S) additive mask, f32

    q_all = q_ref[...]
    # Fold 1/sqrt(hd) into Q once (cheaper than scaling the (NH,S,S) scores).
    q_all = (q_all.astype(jnp.float32) * scale).astype(q_all.dtype)
    k_all = k_ref[...]
    v_all = v_ref[...]

    # TODO(synk): for long sequences (S>=512) a flash-style KV-tiled variant
    # would cut the per-step (S,S) f32 intermediates; fine at these sizes.
    for hi in range(num_heads):
        sl = slice(hi * hd, (hi + 1) * hd)
        qh = q_all[:, sl]                        # (S, hd)
        kh = k_all[:, sl]
        vh = v_all[:, sl]
        s = jax.lax.dot_general(qh, kh, (((1,), (1,)), ((), ())),
                                preferred_element_type=jnp.float32)  # (S, S)
        s = s + mbias
        s = s - jnp.max(s, axis=-1, keepdims=True)
        p = jnp.exp(s)
        p = p * pl.reciprocal(jnp.sum(p, axis=-1, keepdims=True), approx=True)
        ctx = jnp.dot(p.astype(vh.dtype), vh,
                      preferred_element_type=jnp.float32)            # (S, hd)
        o_ref[:, sl] = ctx.astype(o_ref.dtype)


def _pooler_classifier_kernel(cls_ref, wp_ref, bp_ref, wc_ref, bc_ref, o_ref):
    pooled = jnp.tanh(jnp.dot(cls_ref[...], wp_ref[...],
                              preferred_element_type=jnp.float32) + bp_ref[...])
    # nn.Dropout(p=0.3): identity in eval mode (inference forward pass).
    # TODO(synk): training-mode dropout (stochastic masking) not applied here.
    logits = jnp.dot(pooled.astype(wc_ref.dtype), wc_ref[...],
                     preferred_element_type=jnp.float32) + bc_ref[...]
    o_ref[...] = logits


# ----------------------------- wrappers -----------------------------

def dense(x, w, b, activation=None, out_dtype=jnp.bfloat16,
          tm=512, tn=None, tk=None):
    M, K = x.shape
    _, N = w.shape
    tn = N if tn is None else _pick_tile(N, tn)
    tk = _choose_tk(K, tk)
    tm_eff = _choose_tm(M, tm)
    xp = _pad_rows(x, tm_eff)
    Mp = xp.shape[0]
    mt, nt, kt = Mp // tm_eff, N // tn, K // tk
    cost = pl.CostEstimate(
        flops=2 * M * N * K,
        transcendentals=M * N if activation in ("gelu", "tanh") else 0,
        bytes_accessed=(M * K + K * N) * x.dtype.itemsize
        + M * N * jnp.dtype(out_dtype).itemsize)

    if kt == 1:
        out = pl.pallas_call(
            functools.partial(_dense_kernel_onek, activation=activation),
            grid=(mt, nt),
            in_specs=[
                pl.BlockSpec((tm_eff, K), lambda i, j: (i, 0)),
                pl.BlockSpec((K, tn), lambda i, j: (0, j)),
                pl.BlockSpec((1, tn), lambda i, j: (0, j)),
            ],
            out_specs=pl.BlockSpec((tm_eff, tn), lambda i, j: (i, j)),
            out_shape=jax.ShapeDtypeStruct((Mp, N), out_dtype),
            compiler_params=pltpu.CompilerParams(
                dimension_semantics=("parallel", "parallel"),
                vmem_limit_bytes=VMEM_LIMIT_BYTES),
            cost_estimate=cost,
        )(xp, w, b)
    else:
        out = pl.pallas_call(
            functools.partial(_dense_kernel_multik, activation=activation),
            grid=(mt, nt, kt),
            in_specs=[
                pl.BlockSpec((tm_eff, tk), lambda i, j, k: (i, k)),
                pl.BlockSpec((tk, tn), lambda i, j, k: (k, j)),
                pl.BlockSpec((1, tn), lambda i, j, k: (0, j)),
            ],
            out_specs=pl.BlockSpec((tm_eff, tn), lambda i, j, k: (i, j)),
            out_shape=jax.ShapeDtypeStruct((Mp, N), out_dtype),
            scratch_shapes=[pltpu.VMEM((tm_eff, tn), jnp.float32)],
            compiler_params=pltpu.CompilerParams(
                dimension_semantics=("parallel", "parallel", "arbitrary"),
                vmem_limit_bytes=VMEM_LIMIT_BYTES),
            cost_estimate=cost,
        )(xp, w, b)
    return out if Mp == M else out[:M]


def dense_residual_layernorm(x, w, b, residual, gamma, beta,
                             eps=LN_EPS, tm=512, tk=None):
    M, K = x.shape
    _, N = w.shape
    tk = _choose_tk(K, tk)
    tm_eff = _choose_tm(M, tm)
    xp = _pad_rows(x, tm_eff)
    rp = _pad_rows(residual, tm_eff)
    Mp = xp.shape[0]
    mt, kt = Mp // tm_eff, K // tk
    cost = pl.CostEstimate(
        flops=2 * M * N * K, transcendentals=0,
        bytes_accessed=(M * K + K * N + 2 * M * N) * x.dtype.itemsize)

    if kt == 1:
        out = pl.pallas_call(
            functools.partial(_dense_res_ln_kernel_onek, eps=eps),
            grid=(mt,),
            in_specs=[
                pl.BlockSpec((tm_eff, K), lambda i: (i, 0)),
                pl.BlockSpec((K, N), lambda i: (0, 0)),
                pl.BlockSpec((1, N), lambda i: (0, 0)),
                pl.BlockSpec((tm_eff, N), lambda i: (i, 0)),
                pl.BlockSpec((1, N), lambda i: (0, 0)),
                pl.BlockSpec((1, N), lambda i: (0, 0)),
            ],
            out_specs=pl.BlockSpec((tm_eff, N), lambda i: (i, 0)),
            out_shape=jax.ShapeDtypeStruct((Mp, N), jnp.bfloat16),
            compiler_params=pltpu.CompilerParams(
                dimension_semantics=("parallel",),
                vmem_limit_bytes=VMEM_LIMIT_BYTES),
            cost_estimate=cost,
        )(xp, w, b, rp, gamma, beta)
    else:
        out = pl.pallas_call(
            functools.partial(_dense_res_ln_kernel_multik, eps=eps),
            grid=(mt, kt),
            in_specs=[
                pl.BlockSpec((tm_eff, tk), lambda i, k: (i, k)),
                pl.BlockSpec((tk, N), lambda i, k: (k, 0)),
                pl.BlockSpec((1, N), lambda i, k: (0, 0)),
                pl.BlockSpec((tm_eff, N), lambda i, k: (i, 0)),
                pl.BlockSpec((1, N), lambda i, k: (0, 0)),
                pl.BlockSpec((1, N), lambda i, k: (0, 0)),
            ],
            out_specs=pl.BlockSpec((tm_eff, N), lambda i, k: (i, 0)),
            out_shape=jax.ShapeDtypeStruct((Mp, N), jnp.bfloat16),
            scratch_shapes=[pltpu.VMEM((tm_eff, N), jnp.float32)],
            compiler_params=pltpu.CompilerParams(
                dimension_semantics=("parallel", "arbitrary"),
                vmem_limit_bytes=VMEM_LIMIT_BYTES),
            cost_estimate=cost,
        )(xp, w, b, rp, gamma, beta)
    return out if Mp == M else out[:M]


def layernorm(x, gamma, beta, eps=LN_EPS, tm=512):
    M, H = x.shape
    tm_eff = _choose_tm(M, tm)
    xp = _pad_rows(x, tm_eff)
    Mp = xp.shape[0]
    out = pl.pallas_call(
        functools.partial(_layernorm_kernel, eps=eps),
        grid=(Mp // tm_eff,),
        in_specs=[
            pl.BlockSpec((tm_eff, H), lambda i: (i, 0)),
            pl.BlockSpec((1, H), lambda i: (0, 0)),
            pl.BlockSpec((1, H), lambda i: (0, 0)),
        ],
        out_specs=pl.BlockSpec((tm_eff, H), lambda i: (i, 0)),
        out_shape=jax.ShapeDtypeStruct((Mp, H), jnp.bfloat16),
        compiler_params=pltpu.CompilerParams(
            dimension_semantics=("parallel",),
            vmem_limit_bytes=VMEM_LIMIT_BYTES),
    )(xp, gamma, beta)
    return out if Mp == M else out[:M]


def multi_head_attention(qkv, mask_bias, *, num_heads, seq_len):
    # qkv: (B*S, 3H) bf16, columns laid out [Q | K | V].
    # mask_bias: (B, 1, S) f32 additive bias.
    # The three H-wide column strips are read straight from qkv via index_maps
    # (no jnp.split, no head transposes in JAX); output is lane-dense (S, H).
    M, threeH = qkv.shape
    H = threeH // 3
    S = seq_len
    B = M // S
    hd = H // num_heads
    scale = 1.0 / (hd ** 0.5)

    def qkv_spec(col):
        return pl.BlockSpec((S, H), lambda b, c=col: (b, c))

    return pl.pallas_call(
        functools.partial(_attention_kernel, num_heads=num_heads, scale=scale),
        grid=(B,),
        in_specs=[qkv_spec(0), qkv_spec(1), qkv_spec(2),
                  pl.BlockSpec((1, 1, S), lambda b: (b, 0, 0))],
        out_specs=pl.BlockSpec((S, H), lambda b: (b, 0)),
        out_shape=jax.ShapeDtypeStruct((M, H), qkv.dtype),
        compiler_params=pltpu.CompilerParams(
            dimension_semantics=("parallel",),
            vmem_limit_bytes=VMEM_LIMIT_BYTES),
    )(qkv, qkv, qkv, mask_bias)


def pooler_classifier(cls, wp, bp, wc_pad, bc_pad):
    B, _ = cls.shape
    Np = wc_pad.shape[1]
    return pl.pallas_call(
        _pooler_classifier_kernel,
        out_shape=jax.ShapeDtypeStruct((B, Np), jnp.float32),
        compiler_params=pltpu.CompilerParams(
            vmem_limit_bytes=VMEM_LIMIT_BYTES),
    )(cls, wp, bp, wc_pad, bc_pad)


# ----------------------------- model -----------------------------

def init_params(key, *, vocab_size, hidden, num_layers, num_heads,
                intermediate, max_pos, n_classes, class_pad=128):
    del num_heads  # head count only affects the forward computation

    def nrm(k, shape, std=0.02):
        return (std * jax.random.normal(k, shape)).astype(jnp.bfloat16)

    keys = jax.random.split(key, 8 + num_layers)
    n_pad = max(class_pad, n_classes)
    wc = nrm(keys[4], (hidden, n_classes))
    wc_pad = jnp.zeros((hidden, n_pad), jnp.bfloat16).at[:, :n_classes].set(wc)

    params = {
        "word_emb": nrm(keys[0], (vocab_size, hidden)),
        "pos_emb": nrm(keys[1], (max_pos, hidden)),
        "type_emb": nrm(keys[2], (2, hidden)),
        "emb_ln_g": jnp.ones((1, hidden), jnp.float32),
        "emb_ln_b": jnp.zeros((1, hidden), jnp.float32),
        "wp": nrm(keys[3], (hidden, hidden)),
        "bp": jnp.zeros((1, hidden), jnp.float32),
        "wc": wc_pad,                                   # lane-padded to 128
        "bc": jnp.zeros((1, n_pad), jnp.float32),
        "layers": [],
    }
    for li in range(num_layers):
        lk = jax.random.split(keys[8 + li], 4)
        params["layers"].append({
            "w_qkv": nrm(lk[0], (hidden, 3 * hidden)),  # fused [Q|K|V]
            "b_qkv": jnp.zeros((1, 3 * hidden), jnp.float32),
            "wo": nrm(lk[1], (hidden, hidden)),
            "bo": jnp.zeros((1, hidden), jnp.float32),
            "ln1_g": jnp.ones((1, hidden), jnp.float32),
            "ln1_b": jnp.zeros((1, hidden), jnp.float32),
            "wi": nrm(lk[2], (hidden, intermediate)),
            "bi": jnp.zeros((1, intermediate), jnp.float32),
            "wo2": nrm(lk[3], (intermediate, hidden)),
            "bo2": jnp.zeros((1, hidden), jnp.float32),
            "ln2_g": jnp.ones((1, hidden), jnp.float32),
            "ln2_b": jnp.zeros((1, hidden), jnp.float32),
        })
    return params


def humor_classifier_forward(params, input_ids, attention_mask, *,
                             num_heads, n_classes):
    B, S = input_ids.shape
    H = params["word_emb"].shape[1]

    # --- embeddings (gather is plain-JAX glue; LN is a Pallas kernel) ---
    # TODO(synk): token_type ids hardcoded to segment 0 (single-sentence task).
    x = (params["word_emb"][input_ids]
         + params["pos_emb"][:S][None, :, :]
         + params["type_emb"][0][None, None, :])            # (B, S, H) bf16
    h = layernorm(x.reshape(B * S, H),
                  params["emb_ln_g"], params["emb_ln_b"])    # (B*S, H) bf16

    # additive attention-mask bias, shape (B, 1, S)
    mask_bias = ((1.0 - attention_mask.astype(jnp.float32)) * -10000.0
                 ).reshape(B, 1, S)

    # --- transformer encoder layers ---
    for layer in params["layers"]:
        qkv = dense(h, layer["w_qkv"], layer["b_qkv"])        # (B*S, 3H)
        ctx = multi_head_attention(qkv, mask_bias,
                                   num_heads=num_heads, seq_len=S)  # (B*S, H)
        # attention out-projection + residual + LayerNorm fused in one kernel
        h = dense_residual_layernorm(ctx, layer["wo"], layer["bo"], h,
                                     layer["ln1_g"], layer["ln1_b"])
        ffn = dense(h, layer["wi"], layer["bi"], activation="gelu")
        # FFN down-projection + residual + LayerNorm fused in one kernel
        h = dense_residual_layernorm(ffn, layer["wo2"], layer["bo2"], h,
                                     layer["ln2_g"], layer["ln2_b"])

    # --- pooler tanh(W.h[CLS]) + dropout(eval=identity) + classifier ---
    cls = h.reshape(B, S, H)[:, 0, :]                        # (B, H)
    logits_pad = pooler_classifier(cls, params["wp"], params["bp"],
                                   params["wc"], params["bc"])
    return logits_pad[:, :n_classes]                         # (B, n_classes)


# ----------------------------- main -----------------------------

if __name__ == "__main__":
    # Small, lane-aligned demo shapes (real BERT: H=768, S<=512).
    B, S = 2, 8
    VOCAB, HIDDEN, LAYERS, HEADS, INTER, MAX_POS, N_CLASSES = (
        100, 128, 2, 4, 256, 16, 2)

    key = jax.random.PRNGKey(0)
    k_params, k_ids = jax.random.split(key)

    params = init_params(k_params, vocab_size=VOCAB, hidden=HIDDEN,
                         num_layers=LAYERS, num_heads=HEADS,
                         intermediate=INTER, max_pos=MAX_POS,
                         n_classes=N_CLASSES)

    input_ids = jax.random.randint(k_ids, (B, S), 0, VOCAB, dtype=jnp.int32)
    # mimic padding: last two tokens of the second example are padding
    attention_mask = jnp.array([[1] * S, [1] * (S - 2) + [0, 0]], dtype=jnp.int32)

    logits = humor_classifier_forward(params, input_ids, attention_mask,
                                      num_heads=HEADS, n_classes=N_CLASSES)
    jax.block_until_ready(logits)
    assert logits.shape == (B, N_CLASSES)
    assert bool(jnp.all(jnp.isfinite(logits)))
    print("KERNEL_OK")
</pallas_src>

<mosaic_0001>
module attributes {stable_mosaic.version = 11 : i64} {
  func.func @_layernorm_kernel(%arg0: i32, %arg1: memref<16x128xbf16, #tpu.memory_space<vmem>>, %arg2: memref<1x128xf32, #tpu.memory_space<vmem>>, %arg3: memref<1x128xf32, #tpu.memory_space<vmem>>, %arg4: memref<16x128xbf16, #tpu.memory_space<vmem>>) attributes {dimension_semantics = [#tpu.dimension_semantics<parallel>], iteration_bounds = array<i64: 1>, scalar_prefetch = 0 : i64, scratch_operands = 0 : i64, tpu.core_type = #tpu.core_type<tc>, window_params = [{transform_indices = @transform_0, window_bounds = array<i64: 16, 128>}, {pipeline_mode = #tpu.pipeline_mode<synchronous>, transform_indices = @transform_1, window_bounds = array<i64: 1, 128>}, {pipeline_mode = #tpu.pipeline_mode<synchronous>, transform_indices = @transform_2, window_bounds = array<i64: 1, 128>}, {transform_indices = @transform_3, window_bounds = array<i64: 16, 128>}]} {
    %c0 = arith.constant 0 : index
    %c0_0 = arith.constant 0 : index
    %0 = vector.load %arg1[%c0, %c0_0] : memref<16x128xbf16, #tpu.memory_space<vmem>>, vector<16x128xbf16>
    %1 = arith.extf %0 : vector<16x128xbf16> to vector<16x128xf32>
    %cst = arith.constant dense<0.000000e+00> : vector<16xf32>
    %2 = vector.multi_reduction <add>, %1, %cst [1] : vector<16x128xf32> to vector<16xf32>
    %3 = vector.shape_cast %2 : vector<16xf32> to vector<16x1xf32>
    %cst_1 = arith.constant 1.280000e+02 : f32
    %4 = vector.broadcast %cst_1 : f32 to vector<16x1xf32>
    %5 = arith.divf %3, %4 : vector<16x1xf32>
    %6 = vector.broadcast %5 : vector<16x1xf32> to vector<16x128xf32>
    %7 = arith.subf %1, %6 : vector<16x128xf32>
    %8 = arith.mulf %7, %7 : vector<16x128xf32>
    %cst_2 = arith.constant dense<0.000000e+00> : vector<16xf32>
    %9 = vector.multi_reduction <add>, %8, %cst_2 [1] : vector<16x128xf32> to vector<16xf32>
    %10 = vector.shape_cast %9 : vector<16xf32> to vector<16x1xf32>
    %cst_3 = arith.constant 1.280000e+02 : f32
    %11 = vector.broadcast %cst_3 : f32 to vector<16x1xf32>
    %12 = arith.divf %10, %11 : vector<16x1xf32>
    %13 = vector.broadcast %5 : vector<16x1xf32> to vector<16x128xf32>
    %14 = arith.subf %1, %13 : vector<16x128xf32>
    %cst_4 = arith.constant 9.99999996E-13 : f32
    %15 = vector.broadcast %cst_4 : f32 to vector<16x1xf32>
    %16 = arith.addf %12, %15 : vector<16x1xf32>
    %17 = math.rsqrt %16 : vector<16x1xf32>
    %18 = vector.broadcast %17 : vector<16x1xf32> to vector<16x128xf32>
    %19 = arith.mulf %14, %18 : vector<16x128xf32>
    %c0_5 = arith.constant 0 : index
    %c0_6 = arith.constant 0 : index
    %20 = vector.load %arg2[%c0_5, %c0_6] : memref<1x128xf32, #tpu.memory_space<vmem>>, vector<1x128xf32>
    %21 = vector.broadcast %20 : vector<1x128xf32> to vector<16x128xf32>
    %22 = arith.mulf %19, %21 : vector<16x128xf32>
    %c0_7 = arith.constant 0 : index
    %c0_8 = arith.constant 0 : index
    %23 = vector.load %arg3[%c0_7, %c0_8] : memref<1x128xf32, #tpu.memory_space<vmem>>, vector<1x128xf32>
    %24 = vector.broadcast %23 : vector<1x128xf32> to vector<16x128xf32>
    %25 = arith.addf %22, %24 : vector<16x128xf32>
    %26 = arith.truncf %25 : vector<16x128xf32> to vector<16x128xbf16>
    %c0_9 = arith.constant 0 : index
    %c0_10 = arith.constant 0 : index
    %27 = vector.load %arg4[%c0_9, %c0_10] : memref<16x128xbf16, #tpu.memory_space<vmem>>, vector<16x128xbf16>
    tpu.vector_store %arg4[%c0_9, %c0_10], %26 {strides = array<i32>} : memref<16x128xbf16, #tpu.memory_space<vmem>>, vector<16x128xbf16>,
    return
  }
  func.func @transform_0(%arg0: i32) -> (i32, i32) {
    %c0_i32 = arith.constant 0 : i32
    %c0_i32_0 = arith.constant 0 : i32
    return %arg0, %c0_i32 : i32, i32
  }
  func.func @transform_1(%arg0: i32) -> (i32, i32) {
    %c0_i32 = arith.constant 0 : i32
    %c0_i32_0 = arith.constant 0 : i32
    %c0_i32_1 = arith.constant 0 : i32
    return %c0_i32, %c0_i32_0 : i32, i32
  }
  func.func @transform_2(%arg0: i32) -> (i32, i32) {
    %c0_i32 = arith.constant 0 : i32
    %c0_i32_0 = arith.constant 0 : i32
    %c0_i32_1 = arith.constant 0 : i32
    return %c0_i32, %c0_i32_0 : i32, i32
  }
  func.func @transform_3(%arg0: i32) -> (i32, i32) {
    %c0_i32 = arith.constant 0 : i32
    %c0_i32_0 = arith.constant 0 : i32
    return %arg0, %c0_i32 : i32, i32
  }
}

</mosaic_0001>

<bundles_post_ra>
// kernel: tpu_custom_call.1
= control target key start
LH: loop header
LB: loop body
LE: loop exit
PB: predicated region body
PF: predicated region fallthrough
CT: control target
= control target key end

     0   :  { %8 = vsyncpa [#allocation3], 0  ;;  %s210_s0 = inlined_call_operand.hbm [shape: bf16[16,128], index: 0, kind: input, shape index: {}]   ;;  %s211_s1 = inlined_call_operand.vmem [shape: f32[1,128], index: 1, kind: input, shape index: {}]   ;;  %s212_s2 = inlined_call_operand.vmem [shape: f32[1,128], index: 2, kind: input, shape index: {}]   ;;  %s213_s3 = inlined_call_operand.hbm [shape: bf16[16,128], index: 3, kind: output, shape index: {}]  }
   0x1   :  { %9 = vsyncpa [#allocation4], 0  ;;  %s168_s12 = smov [#allocation2]  }
   0x2   :  { %s15_s13 = sshll.u32 %s168_s12, 4  ;;  %s16_s13 = int_to_ptr.vmem [resolvable:$true] %s15_s13 }
   0x3   :  { %s132_s14 = scalar_lea.vmem %s16_s13, 128  ;;  %p137_p1 = scmp.lt.s32.totalorder %s16_s13, %s16_s13 }
   0x4   :  { %p133_p0 = scmp.ne.s32.totalorder %s16_s13, %s132_s14  ;;  %p138_p2 = scmp.lt.s32.totalorder %s132_s14, %s132_s14 }
   0x6   :  { %p139_p3 = por %p138_p2, %p137_p1 }
   0x8   :  { %p140_p4 = pnand %p139_p3, %p133_p0 }
   0xa   :  { %143 = shalt.err (!%p140_p4)
}
   0xb   :  { %s169_s15 = smov 64   ;;  %s170_s16 = smov 4  }
   0xc   :  { %21 = dma.hbm_to_vmem [thread:$0]  %s210_s0, 128, %s16_s13, [#allocation3], %s169_s15, %s169_s15, %s170_s16  }
   0xd   :  { %164 = dma.done.wait [#allocation3], 128  }
   0xe   :  { %165 = vsyncadd [#allocation3], 4294967168  ;;  %v108_v0 = vld [vmem:[#allocation2] sm:$0xff]   ;;  %s171_s22 = smov [#allocation5]  }
   0xf   :  { %v109_v1 = vunpack.c.l.bf16 %v108_v0  ;;  %v110_v2 = vunpack.c.h.bf16 %v108_v0  ;;  %v101_v19 = vld [vmem:[%s211_s1] ss:$0 sm:$0xff]  ;;  %s89_s23 = sshll.u32 %s171_s22, 4  ;;  %s90_s23 = int_to_ptr.vmem [resolvable:$true] %s89_s23 }
  0x10   :  { %v102_v23 = vld [vmem:[%s212_s2] ss:$0 sm:$0xff]  ;;  %s144_s24 = scalar_lea.vmem %s90_s23, 128  ;;  %p149_p6 = scmp.lt.s32.totalorder %s90_s23, %s90_s23 }
  0x11   :  { %33 = vadd.xlane.f32.xlu0 %v109_v1  ;;  %p145_p5 = scmp.ne.s32.totalorder %s90_s23, %s144_s24  ;;  %p150_p7 = scmp.lt.s32.totalorder %s144_s24, %s144_s24 }
  0x13   :  { %p151_p8 = por %p150_p7, %p149_p6 }
  0x15   :  { %35 = vadd.xlane.f32.xlu0 %v110_v2  ;;  %p152_p9 = pnand %p151_p8, %p145_p5 }
  0x9a   :  { %v34_v3 = vpop.xlane.xlu0 %33 }
  0x9b   :  { %v38_v4 = vmul.f32 0.0078125, %v34_v3 }
  0x9d   :  { %v40_v5 = vsub.f32 %v109_v1, %v38_v4 }
  0x9e   :  { %v36_v6 = vpop.xlane.xlu0 %35 }
  0x9f   :  { %v39_v7 = vmul.f32 0.0078125, %v36_v6  ;;  %v42_v8 = vmul.f32 %v40_v5, %v40_v5 }
  0xa1   :  { %v41_v9 = vsub.f32 %v110_v2, %v39_v7  ;;  %44 = vadd.xlane.f32.xlu1 %v42_v8 }
  0xa3   :  { %v43_v10 = vmul.f32 %v41_v9, %v41_v9 }
  0xa5   :  { %46 = vadd.xlane.f32.xlu1 %v43_v10 }
 0x12a   :  { %v45_v11 = vpop.xlane.xlu1 %44 }
 0x12b   :  { %v48_v12 = vmul.f32 0.0078125, %v45_v11 }
 0x12d   :  { %v50_v13 = vadd.f32 1e-12, %v48_v12 }
 0x12e   :  { %v47_v14 = vpop.xlane.xlu1 %46 }
 0x12f   :  { %120 = vrsqrt.f32 %v50_v13  ;;  %v49_v15 = vmul.f32 0.0078125, %v47_v14 }
 0x131   :  { %v51_v16 = vadd.f32 1e-12, %v49_v15 }
 0x133   :  { %122 = vrsqrt.f32 %v51_v16 }
 0x13c   :  { %v121_v17 = vpop.eup %120 }
 0x13d   :  { %v54_v18 = vmul.f32 %v121_v17, %v40_v5 }
 0x13f   :  { %v63_v22 = vmul.f32 %v101_v19, %v54_v18 }
 0x140   :  { %v123_v20 = vpop.eup %122 }
 0x141   :  { %v55_v21 = vmul.f32 %v123_v20, %v41_v9  ;;  %v72_v25 = vadd.f32 %v102_v23, %v63_v22 }
 0x143   :  { %v64_v24 = vmul.f32 %v101_v19, %v55_v21 }
 0x145   :  { %v73_v26 = vadd.f32 %v102_v23, %v64_v24 }
 0x147   :  { %v114_v27 = vpack.c.bf16 %v73_v26, %v72_v25 }
 0x149   :  { %115 = vst [vmem:[#allocation5] sm:$0xff] %v114_v27  }
 0x14a   :  { %155 = shalt.err (!%p152_p9)
}
 0x14b   :  { %95 = dma.vmem_to_hbm [thread:$0]  %s90_s23, 128, %s213_s3, [#allocation4], %s169_s15, %s169_s15, %s170_s16  }
 0x14c   :  { %166 = dma.done.wait [#allocation4], 128  }
 0x14d   :  { %167 = vsyncadd [#allocation4], 4294967168 }
 0x14e   :  { %99 = vsyncpa [#allocation3], 1 }
 0x14f   :  { %100 = vsyncpa [#allocation4], 1 }

</bundles_post_ra>
